<compile_context>
chip_gen: v7x
topology: tpu7x:2x2x1
jax: 0.10.0
libtpu: 0.0.40
codegen_flags: <defaults>
</compile_context>

<pallas_src>
import functools

import jax
import jax.numpy as jnp
from jax.experimental import pallas as pl
from jax.experimental.pallas import tpu as pltpu


# ---------------------------------------------------------------------------
# Kernel: one (M-tile, Cout-tile) grid step of  out = act(patches @ w + b)
# ---------------------------------------------------------------------------
def _matmul_bias_act_kernel(p_ref, w_ref, b_ref, o_ref, *, apply_relu):
    """p_ref: (TM, K) bf16 im2col patches (K = KH*KW*Cin, full contraction)
    w_ref: (K, TN) bf16 reshaped weights
    b_ref: (1, TN) f32 bias (zeros when bias=False)
    o_ref: (TM, TN) output tile
    """
    # Single MXU matmul, f32 accumulation kept in registers (no VMEM scratch).
    acc = jnp.dot(p_ref[...], w_ref[...], preferred_element_type=jnp.float32)
    acc = acc + b_ref[...]                       # broadcast over TM rows
    if apply_relu:
        acc = jnp.maximum(acc, 0.0)
    o_ref[...] = acc.astype(o_ref.dtype)


# ---------------------------------------------------------------------------
# Wrapper (BasicConv.forward equivalent)
# ---------------------------------------------------------------------------
def basic_conv(x, weight, bias=None, *, stride=1, padding=0, dilation=1,
               groups=1, relu=True, bn=False, m_tile=256, cout_tile=128,
               compute_dtype=jnp.bfloat16):
    """Pallas-TPU BasicConv.forward for NCHW inputs.

    x:      (N, Cin, H, W)       float32
    weight: (Cout, Cin, KH, KW)  PyTorch OIHW layout
    bias:   (Cout,) or None      (BasicConv default: bias=False -> None)
    """
    if groups != 1:
        # TODO(synk): grouped convolution (groups>1) not implemented; BasicConv default is 1.
        raise NotImplementedError("only groups=1 supported")
    if bn:
        # TODO(synk): bn=True (BatchNorm2d) not implemented; BasicConv default is bn=False.
        raise NotImplementedError("bn=True not supported")

    n, cin, h, w = x.shape
    cout, cin_w, kh, kw = weight.shape
    assert cin_w == cin, (cin_w, cin)
    ho = (h + 2 * padding - dilation * (kh - 1) - 1) // stride + 1
    wo = (w + 2 * padding - dilation * (kw - 1) - 1) // stride + 1
    assert ho > 0 and wo > 0, "kernel/stride/padding give empty output"

    # NCHW -> NHWC, zero-pad spatially, cast MXU operands to bf16.
    x_nhwc = jnp.transpose(x, (0, 2, 3, 1)).astype(compute_dtype)
    xp = jnp.pad(x_nhwc, ((0, 0), (padding, padding), (padding, padding), (0, 0)))

    # Lane-dense im2col (in the wrapper): (N, Ho, Wo, KH*KW*Cin) with the
    # contraction axis ordered (dy, dx, c) to match the weight reshape below.
    taps = []
    for dy in range(kh):
        for dx in range(kw):
            r0, c0 = dy * dilation, dx * dilation
            taps.append(xp[:, r0:r0 + stride * (ho - 1) + 1:stride,
                             c0:c0 + stride * (wo - 1) + 1:stride, :])
    k_dim = kh * kw * cin
    m = n * ho * wo
    patches = jnp.concatenate(taps, axis=-1).reshape(m, k_dim)

    # Weights OIHW -> HWIO -> (K, Cout); bias kept in f32 for the epilogue.
    w_kc = jnp.transpose(weight, (2, 3, 1, 0)).reshape(k_dim, cout).astype(compute_dtype)
    b = jnp.zeros((cout,), jnp.float32) if bias is None else bias.astype(jnp.float32)

    # Pad M and Cout to tile multiples: keeps output stores unmasked and
    # lane-dense and handles Ho*Wo not divisible by the tile (padded rows are
    # sliced off afterwards).
    tm, tn = m_tile, cout_tile
    m_pad = pl.cdiv(m, tm) * tm
    cout_pad = pl.cdiv(cout, tn) * tn
    if m_pad != m:
        patches = jnp.pad(patches, ((0, m_pad - m), (0, 0)))
    if cout_pad != cout:
        w_kc = jnp.pad(w_kc, ((0, 0), (0, cout_pad - cout)))
        b = jnp.pad(b, (0, cout_pad - cout))
    b2 = b.reshape(1, cout_pad)

    kernel = functools.partial(_matmul_bias_act_kernel, apply_relu=relu)

    out = pl.pallas_call(
        kernel,
        out_shape=jax.ShapeDtypeStruct((m_pad, cout_pad), x.dtype),
        grid=(m_pad // tm, cout_pad // tn),
        in_specs=[
            pl.BlockSpec((tm, k_dim), lambda i, j: (i, 0)),   # patches tile
            pl.BlockSpec((k_dim, tn), lambda i, j: (0, j)),   # weight tile
            pl.BlockSpec((1, tn), lambda i, j: (0, j)),       # bias tile
        ],
        out_specs=pl.BlockSpec((tm, tn), lambda i, j: (i, j)),
        compiler_params=pltpu.CompilerParams(
            dimension_semantics=("parallel", "parallel"),
            vmem_limit_bytes=48 * 1024 * 1024,   # v7x-safe; per-tile footprint is tiny
        ),
    )(patches, w_kc, b2)

    out = out[:m, :cout].reshape(n, ho, wo, cout)
    return jnp.transpose(out, (0, 3, 1, 2))   # NHWC -> NCHW


# ---------------------------------------------------------------------------
if __name__ == "__main__":
    key = jax.random.PRNGKey(0)
    kx, kw_, kb = jax.random.split(key, 3)

    # BasicConv(in_planes=4, out_planes=128, kernel_size=3, padding=1)
    # with module defaults stride=1, relu=True, bn=False, bias=False.
    n, cin, h, w = 2, 4, 16, 16
    cout, ksz, pad = 128, 3, 1

    x = jax.random.normal(kx, (n, cin, h, w), jnp.float32)
    weight = jax.random.normal(kw_, (cout, cin, ksz, ksz), jnp.float32)
    weight = weight * jnp.sqrt(2.0 / (cin * ksz * ksz))       # He init

    conv = jax.jit(functools.partial(basic_conv, padding=pad, relu=True))
    out = jax.block_until_ready(conv(x, weight))
    assert out.shape == (n, cout, h, w), out.shape

    # Reference with the same operand precision (bf16 operands, f32 accumulate).
    ref = jax.lax.conv_general_dilated(
        x.astype(jnp.bfloat16), weight.astype(jnp.bfloat16),
        window_strides=(1, 1), padding=((pad, pad), (pad, pad)),
        dimension_numbers=("NCHW", "OIHW", "NCHW"),
        preferred_element_type=jnp.float32)
    ref = jnp.maximum(ref, 0.0).astype(x.dtype)
    err = float(jnp.max(jnp.abs(out - ref)))
    assert err < 5e-2, f"max abs error vs reference: {err}"

    # Second config: bias=True, relu=False, stride=2, padding=0 (exercises the
    # bias path, the non-divisible M padding, and strided im2col).
    bias_v = jax.random.normal(kb, (cout,), jnp.float32)
    conv2 = jax.jit(functools.partial(basic_conv, padding=0, stride=2, relu=False))
    out2 = jax.block_until_ready(conv2(x, weight, bias_v))
    ho2 = (h - ksz) // 2 + 1
    assert out2.shape == (n, cout, ho2, ho2), out2.shape

    ref2 = jax.lax.conv_general_dilated(
        x.astype(jnp.bfloat16), weight.astype(jnp.bfloat16),
        window_strides=(2, 2), padding=((0, 0), (0, 0)),
        dimension_numbers=("NCHW", "OIHW", "NCHW"),
        preferred_element_type=jnp.float32)
    ref2 = (ref2 + bias_v[None, :, None, None]).astype(x.dtype)
    err2 = float(jnp.max(jnp.abs(out2 - ref2)))
    assert err2 < 5e-2, f"max abs error vs reference (cfg2): {err2}"

    print("KERNEL_OK")
</pallas_src>

<mosaic_0001>
module attributes {stable_mosaic.version = 11 : i64} {
  func.func @_matmul_bias_act_kernel(%arg0: i32, %arg1: i32, %arg2: memref<256x36xbf16, #tpu.memory_space<vmem>>, %arg3: memref<36x128xbf16, #tpu.memory_space<vmem>>, %arg4: memref<1x128xf32, #tpu.memory_space<vmem>>, %arg5: memref<256x128xf32, #tpu.memory_space<vmem>>) attributes {dimension_semantics = [#tpu.dimension_semantics<parallel>, #tpu.dimension_semantics<parallel>], iteration_bounds = array<i64: 2, 1>, scalar_prefetch = 0 : i64, scratch_operands = 0 : i64, tpu.core_type = #tpu.core_type<tc>, window_params = [{transform_indices = @transform_0, window_bounds = array<i64: 256, 36>}, {transform_indices = @transform_1, window_bounds = array<i64: 36, 128>}, {transform_indices = @transform_2, window_bounds = array<i64: 1, 128>}, {transform_indices = @transform_3, window_bounds = array<i64: 256, 128>}]} {
    %c0 = arith.constant 0 : index
    %c0_0 = arith.constant 0 : index
    %0 = vector.load %arg2[%c0, %c0_0] : memref<256x36xbf16, #tpu.memory_space<vmem>>, vector<256x36xbf16>
    %c0_1 = arith.constant 0 : index
    %c0_2 = arith.constant 0 : index
    %1 = vector.load %arg3[%c0_1, %c0_2] : memref<36x128xbf16, #tpu.memory_space<vmem>>, vector<36x128xbf16>
    %cst = arith.constant dense<0.000000e+00> : vector<256x128xf32>
    %2 = tpu.matmul %0, %1, %cst {dimension_numbers = #tpu.dot_dimension_numbers<[1], [0], [0], [1], [0, 0, 1, 1], [], []>} : vector<256x36xbf16>, vector<36x128xbf16>, vector<256x128xf32> -> vector<256x128xf32>
    %c0_3 = arith.constant 0 : index
    %c0_4 = arith.constant 0 : index
    %3 = vector.load %arg4[%c0_3, %c0_4] : memref<1x128xf32, #tpu.memory_space<vmem>>, vector<1x128xf32>
    %4 = vector.broadcast %3 : vector<1x128xf32> to vector<256x128xf32>
    %5 = arith.addf %2, %4 : vector<256x128xf32>
    %cst_5 = arith.constant 0.000000e+00 : f32
    %6 = vector.broadcast %cst_5 : f32 to vector<256x128xf32>
    %7 = arith.maximumf %5, %6 : vector<256x128xf32>
    %c0_6 = arith.constant 0 : index
    %c0_7 = arith.constant 0 : index
    %8 = vector.load %arg5[%c0_6, %c0_7] : memref<256x128xf32, #tpu.memory_space<vmem>>, vector<256x128xf32>
    tpu.vector_store %arg5[%c0_6, %c0_7], %7 {strides = array<i32>} : memref<256x128xf32, #tpu.memory_space<vmem>>, vector<256x128xf32>,
    return
  }
  func.func @transform_0(%arg0: i32, %arg1: i32) -> (i32, i32) {
    %c0_i32 = arith.constant 0 : i32
    %c0_i32_0 = arith.constant 0 : i32
    return %arg0, %c0_i32 : i32, i32
  }
  func.func @transform_1(%arg0: i32, %arg1: i32) -> (i32, i32) {
    %c0_i32 = arith.constant 0 : i32
    %c0_i32_0 = arith.constant 0 : i32
    return %c0_i32, %arg1 : i32, i32
  }
  func.func @transform_2(%arg0: i32, %arg1: i32) -> (i32, i32) {
    %c0_i32 = arith.constant 0 : i32
    %c0_i32_0 = arith.constant 0 : i32
    return %c0_i32, %arg1 : i32, i32
  }
  func.func @transform_3(%arg0: i32, %arg1: i32) -> (i32, i32) {
    %c0_i32 = arith.constant 0 : i32
    return %arg0, %arg1 : i32, i32
  }
}

</mosaic_0001>

<bundles_post_ra>
// kernel: basic_conv.1
= control target key start
LH: loop header
LB: loop body
LE: loop exit
PB: predicated region body
PF: predicated region fallthrough
CT: control target
= control target key end

     0   :  { %8 = vsyncpa [#allocation3], 0  ;;  %s1278_s0 = inlined_call_operand.vmem [shape: bf16[512,36], index: 0, kind: input, shape index: {}]   ;;  %s1279_s1 = inlined_call_operand.vmem [shape: bf16[36,128], index: 1, kind: input, shape index: {}]   ;;  %s1280_s2 = inlined_call_operand.vmem [shape: f32[1,128], index: 2, kind: input, shape index: {}]   ;;  %s1281_s3 = inlined_call_operand.hbm [shape: f32[512,128], index: 3, kind: output, shape index: {}]  }
   0x1   :  { %10 = vsyncpa [#allocation3 + $0x1], 0  ;;  %s1045_s12 = smov 0   ;;  %s1047_s13 = smov 0  }
   0x2   :  { %s1049_s14 = smov 0   ;;  %s1051_s15 = smov 0  }
   0x3   :  { %s1053_s16 = smov 0   ;;  %s1055_s17 = smov 0  }
   0x4 LB: > { %s749_s18 = sadd.s32 4294967295, %s1020_s17   ;;  %s750_s19 = sadd.s32 4294967294, %s1020_s17   ;;  %s1020_s17 = sphi %s1055_s17, %s16_s17   ;;  %s1016_s16 = sphi %s1053_s16, %s1288_s16   ;;  %s1012_s15 = sphi %s1051_s15, %s1287_s15   ;;  %s1008_s14 = sphi %s1049_s14, %s1286_s14   ;;  %s1004_s13 = sphi %s1047_s13, %s1285_s13   ;;  %s1000_s12 = sphi %s1045_s12, %s1284_s12  }
   0x5   : > { %s28_s20 = sadd.s32 1, %s1016_s16  ;;  %s115_s21 = sadd.s32 1, %s1008_s14 }
   0x6   : > { %p30_p0 = scmp.ge.s32.totalorder %s28_s20, 2  ;;  %p125_p1 = scmp.ne.s32.totalorder %s1008_s14, %s1004_s13 }
   0x7   : > { %p126_p2 = scmp.eq.s32.totalorder %s749_s18, 1  ;;  %p131_p3 = scmp.ne.s32.totalorder %s1004_s13, %s1000_s12 }
   0x8   : > { %s1290_s20 = smov (%p30_p0, %s28_s20), 0  ;;  %p132_p5 = scmp.eq.s32.totalorder %s750_s19, 1 }
   0x9   : > { %p1085_p4 = por %p126_p2, %p125_p1  ;;  %s110_s23 = ssub.s32 %s1016_s16, %s1290_s20 }
   0xa   : > { %p755_p6 = scmp.ge.s32.totalorder %s1020_s17, 1  ;;  %p113_p7 = scmp.eq.s32.totalorder %s110_s23, 0 }
   0xb   : > { %p1092_p8 = por %p132_p5, %p131_p3  ;;  %p172_p9 = scmp.lt.s32.totalorder %s1020_s17, 3 }
   0xc   : > { %s1098_s25 = scalar_select %p113_p7, %s1008_s14, %s115_s21  }
   0xd   : > { %p173_p10 = pnand %p755_p6, %p172_p9 }
   0xe   : > { %v923_v0 = vld [vmem:[%s1279_s1] sm:$0xff] (!%p173_p10)   ;;  %v924_v1 = vld [vmem:[%s1279_s1 + $0x8] sm:$0xff] (!%p173_p10)   ;;  %s757_s30 = sshll.u32 (!%p173_p10), %s1012_s15, 5  ;;  %v925_v2 = vld [vmem:[%s1279_s1 + $0x10] ss:$0 sps:$4 sm:$0x33] (!%p173_p10)  }
   0xf   : > { %176 = sbr.rel (%p173_p10) target bundleno = 286 (0x11e), region = 32  ;;  %820 = vmatprep.subr.bf16.mxu0 (!%p173_p10), %v923_v0  ;;  %858 = vmatprep.subr.bf16.mxu1 (!%p173_p10), %v923_v0  ;;  %p204_p11 = scmp.lt.s32.totalorder (!%p173_p10), %s757_s30, 63  ;;  %vm406_vm0 = vcmask (!%p173_p10), 1041408   ;;  %vm357_vm1 = vcmask (!%p173_p10), 293888   ;;  %v1151_v20 = vld [vmem:[%s1280_s2] ss:$0 sm:$0xff] (!%p173_p10) }
  0x10   : > { %821 = vmatpush3.bf16.msra.mxu0 (!%p173_p10), %v923_v0  ;;  %861 = vmatpush3.bf16.msra.mxu1 (!%p173_p10), %v923_v0  ;;  %v408_v3 = vsel (!%p173_p10), %vm406_vm0, %v925_v2, 0  ;;  %s200_s10 = sand.u32 (!%p173_p10), 1, %s1004_s13   ;;  %s800_s23 = sshll.u32 (!%p173_p10), %s1012_s15, 12 }
  0x11   : > { %822 = vmatprep.subr.bf16.mxu0 (!%p173_p10), %v924_v1  ;;  %859 = vmatprep.subr.bf16.mxu1 (!%p173_p10), %v924_v1  ;;  %s756_s19 = sshll.u32 (!%p173_p10), %s200_s10, 8  ;;  %s1220_s28 = scalar_lea.hbm (!%p173_p10), %s1281_s3, %s800_s23 }
  0x12   : > { %s1163_s21 = scalar_lea.vmem (!%p173_p10), [#allocation2], %s756_s19  ;;  %s1232_s29 = scalar_lea.sflag (!%p173_p10), [#allocation3], %s200_s10 }
  0x13   : > { %s650_s26 = sshll.u32 (!%p173_p10), %s1163_s21, 4  ;;  %s1022_s4 = smov (!%p173_p10), [#allocation2]   ;;  %s1222_s26 = int_to_ptr.vmem [resolvable:$true] %s650_s26 }
  0x14   : > { %823 = vmatpush3.bf16.msra.mxu0 (!%p173_p10), %v924_v1  ;;  %862 = vmatpush3.bf16.msra.mxu1 (!%p173_p10), %v924_v1  ;;  %s946_s5 = sshll.u32 (!%p173_p10), %s1022_s4, 4  ;;  %s947_s5 = int_to_ptr.vmem [resolvable:$false] %s946_s5 }
  0x15   : > { %864 = vmatprep.subr.msk.bf16.mxu0 (!%p173_p10), %vm406_vm0, %v925_v2  ;;  %865 = vmatprep.subr.msk.bf16.mxu1 (!%p173_p10), %vm406_vm0, %v925_v2  ;;  %p949_p1 = scmp.lt.s32.totalorder (!%p173_p10), %s1222_s26, %s947_s5 }
  0x16   : > { %s1292_s30 = smov (!%p204_p11, %s757_s30), 63 }
  0x17   : > { %s758_s6 = sshll.u32 %s1292_s30, 2  ;;  %s942_s30 = scalar_lea.vmem %s1222_s26, 4096 }
  0x18   : > { %s1113_s9 = scalar_lea.vmem %s1278_s0, %s758_s6  ;;  %825 = vmatpush3.bf16.msra.mxu0 %v408_v3  ;;  %863 = vmatpush3.bf16.msra.mxu1 %v408_v3  ;;  %p943_p12 = scmp.ne.s32.totalorder %s1222_s26, %s942_s30 }
  0x19   : > { %v926_v4 = vld [vmem:[%s1113_s9] sm:$0xff]   ;;  %v928_v6 = vld [vmem:[%s1113_s9 + $0x8] sm:$0xff]   ;;  %v930_v8 = vld [vmem:[%s1113_s9 + $0x10] sm:$0xff]   ;;  %s948_s6 = scalar_lea.vmem %s947_s5, 8192 }
  0x1a   : > { %v927_v5 = vld [vmem:[%s1113_s9 + $0x40] sm:$0xff]   ;;  %826 = vmatprep.mubr.msk.bf16.mxu0 %vm357_vm1, %v926_v4  ;;  %v929_v7 = vld [vmem:[%s1113_s9 + $0x48] sm:$0xff]   ;;  %v931_v9 = vld [vmem:[%s1113_s9 + $0x50] sm:$0xff]   ;;  %p944_p13 = pnand %p943_p12, %p1085_p4  ;;  %p950_p2 = scmp.lt.s32.totalorder %s948_s6, %s942_s30 }
  0x1b   : > { %842 = vmatprep.mubr.msk.bf16.mxu1 %vm357_vm1, %v927_v5  ;;  %827 = vmatmul.mubr.msk.bf16.vlgmr.msra.gmra.mrb[0].mxu0 %vm357_vm1, %v928_v6  ;;  %v932_v10 = vld [vmem:[%s1113_s9 + $0x18] sm:$0xff]   ;;  %v934_v12 = vld [vmem:[%s1113_s9 + $0x20] sm:$0xff]   ;;  %v936_v14 = vld [vmem:[%s1113_s9 + $0x28] sm:$0xff]  }
  0x1c   : > { %843 = vmatmul.mubr.msk.bf16.vlgmr.msra.gmra.mrb[0].mxu1 %vm357_vm1, %v929_v7  ;;  %830 = vmatprep.mubr.msk.bf16.mxu0 %vm357_vm1, %v930_v8  ;;  %v933_v11 = vld [vmem:[%s1113_s9 + $0x58] sm:$0xff]   ;;  %v935_v13 = vld [vmem:[%s1113_s9 + $0x60] sm:$0xff]   ;;  %v937_v15 = vld [vmem:[%s1113_s9 + $0x68] sm:$0xff]   ;;  %p945_p0 = pneg %p944_p13  ;;  %p951_p3 = por %p950_p2, %p949_p1 }
  0x1d   : > { %846 = vmatprep.mubr.msk.bf16.mxu1 %vm357_vm1, %v931_v9  ;;  %v938_v16 = vld [vmem:[%s1113_s9 + $0x30] sm:$0xff]   ;;  %v940_v18 = vld [vmem:[%s1113_s9 + $0x38] sm:$0xff]  }
  0x1e   : > { %v939_v17 = vld [vmem:[%s1113_s9 + $0x70] sm:$0xff]   ;;  %v941_v19 = vld [vmem:[%s1113_s9 + $0x78] sm:$0xff]   ;;  %p952_p5 = pnand %p951_p3, %p945_p0 }
  0x23   : > { %831 = vmatmul.mubr.msk.bf16.gmra.mrb[4].mxu0 %vm357_vm1, %v932_v10 }
  0x24   : > { %847 = vmatmul.mubr.msk.bf16.gmra.mrb[4].mxu1 %vm357_vm1, %v933_v11  ;;  %834 = vmatprep.mubr.msk.bf16.mxu0 %vm357_vm1, %v934_v12 }
  0x25   : > { %850 = vmatprep.mubr.msk.bf16.mxu1 %vm357_vm1, %v935_v13 }
  0x2b   : > { %835 = vmatmul.mubr.msk.bf16.gmra.mrb[8].mxu0 %vm357_vm1, %v936_v14 }
  0x2c   : > { %851 = vmatmul.mubr.msk.bf16.gmra.mrb[8].mxu1 %vm357_vm1, %v937_v15  ;;  %838 = vmatprep.mubr.msk.bf16.mxu0 %vm357_vm1, %v938_v16 }
  0x2d   : > { %854 = vmatprep.mubr.msk.bf16.mxu1 %vm357_vm1, %v939_v17 }
  0x33   : > { %839 = vmatmul.mubr.msk.bf16.gmra.mrb[12].mxu0 %vm357_vm1, %v940_v18 }
  0x34   : > { %855 = vmatmul.mubr.msk.bf16.gmra.mrb[12].mxu1 %vm357_vm1, %v941_v19 }
  0xee   : > { %v828_v21 = vpop.f32.mrb[0].mxu0 }
  0xef   : > { %v844_v22 = vpop.f32.mrb[0].mxu1  ;;  %v453_v23 = vadd.f32 %v828_v21, %v1151_v20  ;;  %v444_v25 = vpop.f32.mrb[1].mxu0 }
  0xf0   : > { %v517_v24 = vadd.f32 %v844_v22, %v1151_v20  ;;  %v508_v26 = vpop.f32.mrb[1].mxu1  ;;  %v445_v27 = vadd.f32 %v1151_v20, %v444_v25  ;;  %v829_v29 = vpop.f32.mrb[2].mxu0 }
  0xf1   : > { %v509_v28 = vadd.f32 %v1151_v20, %v508_v26  ;;  %v845_v30 = vpop.f32.mrb[2].mxu1  ;;  %v573_v31 = vmax.f32 %v453_v23, 0.0  ;;  %v456_v33 = vadd.f32 %v829_v29, %v1151_v20  ;;  %v447_v35 = vpop.f32.mrb[3].mxu0 }
  0xf2   : > { %v589_v32 = vmax.f32 %v517_v24, 0.0  ;;  %v520_v34 = vadd.f32 %v845_v30, %v1151_v20  ;;  %v511_v36 = vpop.f32.mrb[3].mxu1  ;;  %v571_v37 = vmax.f32 %v445_v27, 0.0  ;;  %v448_v39 = vadd.f32 %v1151_v20, %v447_v35 }
  0xf3   : > { %v587_v38 = vmax.f32 %v509_v28, 0.0  ;;  %v512_v40 = vadd.f32 %v1151_v20, %v511_v36  ;;  %605 = vst [vmem:[%s1163_s21 + $0x10] sm:$0xff] %v573_v31  ;;  %v574_v41 = vmax.f32 %v456_v33, 0.0 }
  0xf4   : > { %621 = vst [vmem:[%s1163_s21 + $0x90] sm:$0xff] %v589_v32  ;;  %v590_v42 = vmax.f32 %v520_v34, 0.0  ;;  %603 = vst [vmem:[%s1163_s21] sm:$0xff] %v571_v37  ;;  %v572_v43 = vmax.f32 %v448_v39, 0.0 }
  0xf5   : > { %619 = vst [vmem:[%s1163_s21 + $0x80] sm:$0xff] %v587_v38  ;;  %v588_v44 = vmax.f32 %v512_v40, 0.0  ;;  %606 = vst [vmem:[%s1163_s21 + $0x18] sm:$0xff] %v574_v41 }
  0xf6   : > { %622 = vst [vmem:[%s1163_s21 + $0x98] sm:$0xff] %v590_v42  ;;  %604 = vst [vmem:[%s1163_s21 + $0x8] sm:$0xff] %v572_v43  ;;  %v832_v45 = vpop.f32.mrb[4].mxu0 }
  0xf7   : > { %620 = vst [vmem:[%s1163_s21 + $0x88] sm:$0xff] %v588_v44  ;;  %v848_v46 = vpop.f32.mrb[4].mxu1  ;;  %v469_v47 = vadd.f32 %v832_v45, %v1151_v20  ;;  %v460_v49 = vpop.f32.mrb[5].mxu0 }
  0xf8   : > { %v533_v48 = vadd.f32 %v848_v46, %v1151_v20  ;;  %v524_v50 = vpop.f32.mrb[5].mxu1  ;;  %v461_v51 = vadd.f32 %v1151_v20, %v460_v49  ;;  %v833_v53 = vpop.f32.mrb[6].mxu0 }
  0xf9   : > { %v525_v52 = vadd.f32 %v1151_v20, %v524_v50  ;;  %v849_v54 = vpop.f32.mrb[6].mxu1  ;;  %v577_v55 = vmax.f32 %v469_v47, 0.0  ;;  %v472_v57 = vadd.f32 %v833_v53, %v1151_v20  ;;  %v463_v59 = vpop.f32.mrb[7].mxu0 }
  0xfa   : > { %v593_v56 = vmax.f32 %v533_v48, 0.0  ;;  %v536_v58 = vadd.f32 %v849_v54, %v1151_v20  ;;  %v527_v60 = vpop.f32.mrb[7].mxu1  ;;  %v575_v61 = vmax.f32 %v461_v51, 0.0  ;;  %v464_v63 = vadd.f32 %v1151_v20, %v463_v59 }
  0xfb   : > { %v591_v62 = vmax.f32 %v525_v52, 0.0  ;;  %v528_v0 = vadd.f32 %v1151_v20, %v527_v60  ;;  %609 = vst [vmem:[%s1163_s21 + $0x30] sm:$0xff] %v577_v55  ;;  %v578_v1 = vmax.f32 %v472_v57, 0.0 }
  0xfc   : > { %625 = vst [vmem:[%s1163_s21 + $0xb0] sm:$0xff] %v593_v56  ;;  %v594_v2 = vmax.f32 %v536_v58, 0.0  ;;  %607 = vst [vmem:[%s1163_s21 + $0x20] sm:$0xff] %v575_v61  ;;  %v576_v3 = vmax.f32 %v464_v63, 0.0 }
  0xfd   : > { %623 = vst [vmem:[%s1163_s21 + $0xa0] sm:$0xff] %v591_v62  ;;  %v592_v4 = vmax.f32 %v528_v0, 0.0  ;;  %610 = vst [vmem:[%s1163_s21 + $0x38] sm:$0xff] %v578_v1 }
  0xfe   : > { %626 = vst [vmem:[%s1163_s21 + $0xb8] sm:$0xff] %v594_v2  ;;  %608 = vst [vmem:[%s1163_s21 + $0x28] sm:$0xff] %v576_v3  ;;  %v836_v5 = vpop.f32.mrb[8].mxu0 }
  0xff   : > { %624 = vst [vmem:[%s1163_s21 + $0xa8] sm:$0xff] %v592_v4  ;;  %v852_v6 = vpop.f32.mrb[8].mxu1  ;;  %v485_v7 = vadd.f32 %v836_v5, %v1151_v20  ;;  %v476_v9 = vpop.f32.mrb[9].mxu0 }
 0x100   : > { %v549_v8 = vadd.f32 %v852_v6, %v1151_v20  ;;  %v540_v10 = vpop.f32.mrb[9].mxu1  ;;  %v477_v11 = vadd.f32 %v1151_v20, %v476_v9  ;;  %v837_v13 = vpop.f32.mrb[10].mxu0 }
 0x101   : > { %v541_v12 = vadd.f32 %v1151_v20, %v540_v10  ;;  %v853_v14 = vpop.f32.mrb[10].mxu1  ;;  %v581_v15 = vmax.f32 %v485_v7, 0.0  ;;  %v488_v17 = vadd.f32 %v837_v13, %v1151_v20  ;;  %v479_v19 = vpop.f32.mrb[11].mxu0 }
 0x102   : > { %v597_v16 = vmax.f32 %v549_v8, 0.0  ;;  %v552_v18 = vadd.f32 %v853_v14, %v1151_v20  ;;  %v543_v21 = vpop.f32.mrb[11].mxu1  ;;  %v579_v22 = vmax.f32 %v477_v11, 0.0  ;;  %v480_v24 = vadd.f32 %v1151_v20, %v479_v19 }
 0x103   : > { %v595_v23 = vmax.f32 %v541_v12, 0.0  ;;  %v544_v25 = vadd.f32 %v1151_v20, %v543_v21  ;;  %613 = vst [vmem:[%s1163_s21 + $0x50] sm:$0xff] %v581_v15  ;;  %v582_v26 = vmax.f32 %v488_v17, 0.0 }
 0x104   : > { %629 = vst [vmem:[%s1163_s21 + $0xd0] sm:$0xff] %v597_v16  ;;  %v598_v27 = vmax.f32 %v552_v18, 0.0  ;;  %611 = vst [vmem:[%s1163_s21 + $0x40] sm:$0xff] %v579_v22  ;;  %v580_v28 = vmax.f32 %v480_v24, 0.0 }
 0x105   : > { %627 = vst [vmem:[%s1163_s21 + $0xc0] sm:$0xff] %v595_v23  ;;  %v596_v29 = vmax.f32 %v544_v25, 0.0  ;;  %614 = vst [vmem:[%s1163_s21 + $0x58] sm:$0xff] %v582_v26 }
 0x106   : > { %630 = vst [vmem:[%s1163_s21 + $0xd8] sm:$0xff] %v598_v27  ;;  %612 = vst [vmem:[%s1163_s21 + $0x48] sm:$0xff] %v580_v28  ;;  %v840_v30 = vpop.f32.mrb[12].mxu0 }
 0x107   : > { %628 = vst [vmem:[%s1163_s21 + $0xc8] sm:$0xff] %v596_v29  ;;  %v856_v31 = vpop.f32.mrb[12].mxu1  ;;  %v501_v32 = vadd.f32 %v840_v30, %v1151_v20  ;;  %v492_v34 = vpop.f32.mrb[13].mxu0 }
 0x108   : > { %v565_v33 = vadd.f32 %v856_v31, %v1151_v20  ;;  %v556_v35 = vpop.f32.mrb[13].mxu1  ;;  %v493_v36 = vadd.f32 %v1151_v20, %v492_v34  ;;  %v841_v38 = vpop.f32.mrb[14].mxu0 }
 0x109   : > { %v557_v37 = vadd.f32 %v1151_v20, %v556_v35  ;;  %v857_v39 = vpop.f32.mrb[14].mxu1  ;;  %v585_v40 = vmax.f32 %v501_v32, 0.0  ;;  %v504_v42 = vadd.f32 %v841_v38, %v1151_v20  ;;  %v495_v44 = vpop.f32.mrb[15].mxu0 }
 0x10a   : > { %v601_v41 = vmax.f32 %v565_v33, 0.0  ;;  %v568_v43 = vadd.f32 %v857_v39, %v1151_v20  ;;  %v559_v45 = vpop.f32.mrb[15].mxu1  ;;  %v583_v46 = vmax.f32 %v493_v36, 0.0  ;;  %v496_v48 = vadd.f32 %v1151_v20, %v495_v44 }
 0x10b   : > { %v599_v47 = vmax.f32 %v557_v37, 0.0  ;;  %v560_v49 = vadd.f32 %v1151_v20, %v559_v45  ;;  %617 = vst [vmem:[%s1163_s21 + $0x70] sm:$0xff] %v585_v40  ;;  %v586_v50 = vmax.f32 %v504_v42, 0.0 }
 0x10c   : > { %633 = vst [vmem:[%s1163_s21 + $0xf0] sm:$0xff] %v601_v41  ;;  %v602_v51 = vmax.f32 %v568_v43, 0.0  ;;  %615 = vst [vmem:[%s1163_s21 + $0x60] sm:$0xff] %v583_v46  ;;  %v584_v52 = vmax.f32 %v496_v48, 0.0 }
 0x10d   : > { %631 = vst [vmem:[%s1163_s21 + $0xe0] sm:$0xff] %v599_v47  ;;  %v600_v53 = vmax.f32 %v560_v49, 0.0  ;;  %618 = vst [vmem:[%s1163_s21 + $0x78] sm:$0xff] %v586_v50 }
 0x10e   : > { %634 = vst [vmem:[%s1163_s21 + $0xf8] sm:$0xff] %v602_v51  ;;  %616 = vst [vmem:[%s1163_s21 + $0x68] sm:$0xff] %v584_v52 }
 0x10f   : > { %632 = vst [vmem:[%s1163_s21 + $0xe8] sm:$0xff] %v600_v53 }
 0x110   : > { %955 = shalt.err (!%p952_p5)
}
 0x111   : > { %s956_s7 = scalar_lea.hbm %s1220_s28, 4096  ;;  %s960_s10 = scalar_lea.hbm %s1281_s3, 8192 }
 0x112   : > { %p957_p6 = scmp.ne.s32.totalorder %s1220_s28, %s956_s7  ;;  %p961_p10 = scmp.lt.u32.totalorder %s1220_s28, %s1281_s3 }
 0x113   : > { %p962_p11 = scmp.lt.u32.totalorder %s960_s10, %s956_s7  ;;  %p964_p13 = scmp.lt.u32.totalorder %s956_s7, %s1220_s28 }
 0x114   : > { %p958_p7 = pnand %p957_p6, %p1085_p4 }
 0x115   : > { %p963_p12 = por %p962_p11, %p961_p10 }
 0x116   : > { %p959_p9 = pneg %p958_p7 }
 0x117   : > { %p965_p0 = por %p964_p13, %p963_p12 }
 0x119   : > { %p966_p1 = pnand %p965_p0, %p959_p9 }
 0x11b   : > { %969 = shalt.err (!%p966_p1)
}
 0x11c   : > { %s1023_s19 = smov 128   ;;  %s1024_s21 = smov 8  }
 0x11d   : > { %866 = dma.vmem_to_hbm [thread:$0]  (%p1085_p4), %s1222_s26, 4096, %s1220_s28, %s1232_s29, %s1023_s19, %s1023_s19, %s1024_s21  }
 0x11e PF: > { %p872_p2 = scmp.ge.s32.totalorder %s1020_s17, 2  ;;  %s665_s23 = sand.u32 1, %s1000_s12  }
 0x11f   : > { %s666_s15 = scalar_lea.sflag [#allocation3], %s665_s23 }
 0x120   : > { %p869_p3 = pnand %p872_p2, %p1092_p8 }
 0x122   : > { %995 = dma.done.wait (!%p869_p3), %s666_s15, 4096  }
 0x123   : > { %997 = vsyncadd (!%p869_p3), %s666_s15, 4294963200  ;;  %s16_s17 = sadd.s32 1, %s1020_s17   ;;  %s1284_s12 = smov %s1004_s13 }
 0x124   : > { %p13_p5 = scmp.ge.s32.totalorder %s16_s17, 4   ;;  %s1285_s13 = smov %s1008_s14 }
 0x125   : > { %s1286_s14 = smov %s1098_s25  ;;  %s1287_s15 = smov %s1016_s16 }
 0x126   : > { %s1288_s16 = smov %s1290_s20  ;;  %15 = sbr.rel (!%p13_p5) target bundleno = 4 (0x4), region = 73 }
 0x12d   :  { %671 = vsyncpa [#allocation3], 1 }
 0x12e   :  { %673 = vsyncpa [#allocation3 + $0x1], 1 }

</bundles_post_ra>
